<compile_context>
chip_gen: v7x
topology: tpu7x:2x2x1
jax: 0.10.0
libtpu: 0.0.40
codegen_flags: <defaults>
</compile_context>

<pallas_src>
import math

import jax
import jax.numpy as jnp
from jax.experimental import pallas as pl
from jax.experimental.pallas import tpu as pltpu


def _bias_tuner_kernel(x_ref, scale_ref, bias_ref, o_ref):
    # x_ref / o_ref: (TB, TC)  current tile of flattened tokens
    # scale_ref / bias_ref: (1, TC)  broadcast over the row (batch) axis
    o_ref[...] = x_ref[...] * scale_ref[...] + bias_ref[...]


def _largest_tile(full, quantum, cap):
    """Largest t <= cap with t % quantum == 0 and full % t == 0 (None if none)."""
    if full % quantum != 0:
        return None
    best = None
    t = quantum
    limit = min(full, cap)
    while t <= limit:
        if full % t == 0:
            best = t
        t += quantum
    return best


def bias_tuner(tokens, scale, bias, *, target_block_bytes=4 * 1024 * 1024,
               donate_tokens=False):
    """tokens: (..., *tune_shape); scale/bias: tune_shape.

    Returns tokens * scale + bias (same broadcasting as the torch module).
    """
    tune_shape = scale.shape
    assert bias.shape == tune_shape
    k = len(tune_shape)
    # TODO(synk): only exact trailing-shape broadcast is supported (size-1
    # broadcast dims inside tune_shape are not handled here).
    assert tokens.shape[-k:] == tune_shape, (tokens.shape, tune_shape)

    orig_shape = tokens.shape
    lead = tokens.shape[:-k]
    B = math.prod(lead) if lead else 1
    N = math.prod(tune_shape)
    itemsize = jnp.dtype(tokens.dtype).itemsize

    # Flatten: tokens -> (B, N), params -> (1, N). Lane dim is now S*H, so it
    # is lane-dense (multiple of 128) whenever the flattened size allows it.
    x2 = tokens.reshape(B, N)
    s2 = scale.astype(tokens.dtype).reshape(1, N)
    b2 = bias.astype(tokens.dtype).reshape(1, N)

    # ---- tile selection -----------------------------------------------
    # Legality: each block dim must be a multiple of (8, 128) or equal the
    # full array dim. Aim for a few MiB per tokens block; keep >= 2 grid
    # steps when possible so work shards across TensorCores.
    if B % 8 == 0:
        TC = _largest_tile(N, 128, 2048) or N
        row_target = max(8, target_block_bytes // max(TC * itemsize, 1))
        TB = _largest_tile(B, 8, row_target) or B
    else:
        TB = B  # full leading dim (always legal)
        lane_target = max(128, target_block_bytes // max(TB * itemsize, 1))
        if N % 256 == 0:
            # leave at least 2 lane tiles so the grid has >1 step
            lane_target = min(lane_target, N // 2)
        TC = _largest_tile(N, 128, lane_target) or N

    # If everything collapsed to a single grid step, try to split one axis
    # (keeps both TensorCores busy on v7x).
    if (N // TC) * (B // TB) == 1:
        if TB % 2 == 0 and (TB // 2) % 8 == 0:
            TB //= 2
        elif TC % 256 == 0:
            TC //= 2

    grid = (N // TC, B // TB)  # lane tiles OUTER -> scale/bias stay resident

    cost = pl.CostEstimate(
        flops=2 * B * N,
        transcendentals=0,
        bytes_accessed=(2 * B * N + 2 * N) * itemsize,
    )

    kwargs = {}
    if donate_tokens:
        # Reuse the tokens HBM buffer for the output when the caller no
        # longer needs the original tokens.
        kwargs["input_output_aliases"] = {0: 0}

    out2 = pl.pallas_call(
        _bias_tuner_kernel,
        out_shape=jax.ShapeDtypeStruct((B, N), tokens.dtype),
        grid_spec=pltpu.PrefetchScalarGridSpec(
            num_scalar_prefetch=0,
            grid=grid,
            in_specs=[
                pl.BlockSpec((TB, TC), lambda j, i: (i, j)),   # tokens
                pl.BlockSpec((1, TC), lambda j, i: (0, j)),    # scaling_param
                pl.BlockSpec((1, TC), lambda j, i: (0, j)),    # bias_param
            ],
            out_specs=pl.BlockSpec((TB, TC), lambda j, i: (i, j)),
        ),
        compiler_params=pltpu.CompilerParams(
            dimension_semantics=("parallel", "parallel"),
            vmem_limit_bytes=64 * 1024 * 1024,
        ),
        cost_estimate=cost,
        **kwargs,
    )(x2, s2, b2)

    return out2.reshape(orig_shape)


if __name__ == "__main__":
    key = jax.random.PRNGKey(0)
    k_tok, k_scale, k_bias = jax.random.split(key, 3)

    B, S, H = 2, 8, 32
    tune_shape = (S, H)

    tokens = jax.random.normal(k_tok, (B, S, H), dtype=jnp.float32)

    # BiasTuner(init_rand=True): both params drawn from a standard normal so
    # the kernel does nontrivial work (init_rand=False would be identity).
    scaling_param = jax.random.normal(k_scale, tune_shape, dtype=jnp.float32)
    bias_param = jax.random.normal(k_bias, tune_shape, dtype=jnp.float32)

    # Reference (plain JAX, same broadcasting as torch).
    ref = tokens * scaling_param + bias_param

    out = bias_tuner(tokens, scaling_param, bias_param)
    out = jax.block_until_ready(out)

    assert out.shape == (B, S, H)
    assert jnp.allclose(out, ref, atol=1e-6, rtol=1e-6)

    print("KERNEL_OK")
</pallas_src>

<mosaic_0001>
module attributes {stable_mosaic.version = 11 : i64} {
  func.func @_bias_tuner_kernel(%arg0: i32, %arg1: i32, %arg2: memref<2x128xf32, #tpu.memory_space<vmem>>, %arg3: memref<1x128xf32, #tpu.memory_space<vmem>>, %arg4: memref<1x128xf32, #tpu.memory_space<vmem>>, %arg5: memref<2x128xf32, #tpu.memory_space<vmem>>) attributes {dimension_semantics = [#tpu.dimension_semantics<parallel>, #tpu.dimension_semantics<parallel>], iteration_bounds = array<i64: 2, 1>, scalar_prefetch = 0 : i64, scratch_operands = 0 : i64, tpu.core_type = #tpu.core_type<tc>, window_params = [{transform_indices = @transform_0, window_bounds = array<i64: 2, 128>}, {transform_indices = @transform_1, window_bounds = array<i64: 1, 128>}, {transform_indices = @transform_2, window_bounds = array<i64: 1, 128>}, {transform_indices = @transform_3, window_bounds = array<i64: 2, 128>}]} {
    %c0 = arith.constant 0 : index
    %c0_0 = arith.constant 0 : index
    %0 = vector.load %arg2[%c0, %c0_0] : memref<2x128xf32, #tpu.memory_space<vmem>>, vector<2x128xf32>
    %c0_1 = arith.constant 0 : index
    %c0_2 = arith.constant 0 : index
    %1 = vector.load %arg3[%c0_1, %c0_2] : memref<1x128xf32, #tpu.memory_space<vmem>>, vector<1x128xf32>
    %2 = vector.broadcast %1 : vector<1x128xf32> to vector<2x128xf32>
    %3 = arith.mulf %0, %2 : vector<2x128xf32>
    %c0_3 = arith.constant 0 : index
    %c0_4 = arith.constant 0 : index
    %4 = vector.load %arg4[%c0_3, %c0_4] : memref<1x128xf32, #tpu.memory_space<vmem>>, vector<1x128xf32>
    %5 = vector.broadcast %4 : vector<1x128xf32> to vector<2x128xf32>
    %6 = arith.addf %3, %5 : vector<2x128xf32>
    %c0_5 = arith.constant 0 : index
    %c0_6 = arith.constant 0 : index
    %7 = vector.load %arg5[%c0_5, %c0_6] : memref<2x128xf32, #tpu.memory_space<vmem>>, vector<2x128xf32>
    tpu.vector_store %arg5[%c0_5, %c0_6], %6 {strides = array<i32>} : memref<2x128xf32, #tpu.memory_space<vmem>>, vector<2x128xf32>,
    return
  }
  func.func @transform_0(%arg0: i32, %arg1: i32) -> (i32, i32) {
    %c0_i32 = arith.constant 0 : i32
    return %arg1, %arg0 : i32, i32
  }
  func.func @transform_1(%arg0: i32, %arg1: i32) -> (i32, i32) {
    %c0_i32 = arith.constant 0 : i32
    %c0_i32_0 = arith.constant 0 : i32
    return %c0_i32, %arg0 : i32, i32
  }
  func.func @transform_2(%arg0: i32, %arg1: i32) -> (i32, i32) {
    %c0_i32 = arith.constant 0 : i32
    %c0_i32_0 = arith.constant 0 : i32
    return %c0_i32, %arg0 : i32, i32
  }
  func.func @transform_3(%arg0: i32, %arg1: i32) -> (i32, i32) {
    %c0_i32 = arith.constant 0 : i32
    return %arg1, %arg0 : i32, i32
  }
}

</mosaic_0001>

<bundles_post_ra>
// kernel: tpu_custom_call.1
= control target key start
LH: loop header
LB: loop body
LE: loop exit
PB: predicated region body
PF: predicated region fallthrough
CT: control target
= control target key end

     0   :  { %s965_s0 = inlined_call_operand.hbm [shape: f32[2,256], index: 0, kind: input, shape index: {}]   ;;  %s966_s1 = inlined_call_operand.hbm [shape: f32[1,256], index: 1, kind: input, shape index: {}]   ;;  %s967_s2 = inlined_call_operand.hbm [shape: f32[1,256], index: 2, kind: input, shape index: {}]   ;;  %s968_s3 = inlined_call_operand.hbm [shape: f32[2,256], index: 3, kind: output, shape index: {}]  }
   0x1   :  { %974 = sst [smem:[#allocation15_spill]] %s966_s1 }
   0x2   :  { %8 = vsyncpa [#allocation3], 0 }
   0x3   :  { %10 = vsyncpa [#allocation3 + $0x1], 0 }
   0x4   :  { %11 = vsyncpa [#allocation6], 0 }
   0x5   :  { %13 = vsyncpa [#allocation6 + $0x1], 0 }
   0x6   :  { %14 = vsyncpa [#allocation4], 0 }
   0x7   :  { %16 = vsyncpa [#allocation4 + $0x1], 0  ;;  %s713_s12 = smov 0   ;;  %s715_s13 = smov 0  }
   0x8   :  { %s717_s14 = smov 0   ;;  %s719_s15 = smov 0  }
   0x9   :  { %s721_s16 = smov 0   ;;  %s723_s17 = smov 0  }
   0xa LB: > { %975 = sst [smem:[#allocation12_spill]] %s683_s16  ;;  %s744_s18 = sadd.s32 4294967295, %s687_s17   ;;  %s687_s17 = sphi %s723_s17, %s22_s17   ;;  %s683_s16 = sphi %s721_s16, %s994_s16   ;;  %s679_s15 = sphi %s719_s15, %s993_s15   ;;  %s675_s14 = sphi %s717_s14, %s997_s14   ;;  %s671_s13 = sphi %s715_s13, %s996_s13   ;;  %s667_s12 = sphi %s713_s12, %s995_s12  }
   0xb   : > { %s423_s19 = sadd.s32 4294967294, %s687_s17   ;;  %s34_s20 = sadd.s32 1, %s683_s16 }
   0xc   : > { %s43_s21 = sadd.s32 1, %s675_s14  ;;  %p36_p0 = scmp.ge.s32.totalorder %s34_s20, 2 }
   0xd   : > { %p50_p1 = scmp.ne.s32.totalorder %s675_s14, %s671_s13  ;;  %p51_p2 = scmp.eq.s32.totalorder %s687_s17, 0 }
   0xe   : > { %p56_p3 = scmp.ne.s32.totalorder %s671_s13, %s667_s12  ;;  %s999_s20 = smov (%p36_p0, %s34_s20), 0 }
   0xf   : > { %976 = sst [smem:[#allocation13_spill]] %s999_s20  ;;  %p756_p4 = por %p51_p2, %p50_p1 }
  0x10   : > { %p57_p5 = scmp.eq.s32.totalorder %s744_s18, 0  ;;  %s39_s23 = ssub.s32 %s683_s16, %s999_s20 }
  0x11   : > { %p134_p6 = scmp.eq.s32.totalorder %s744_s18, 1  ;;  %p41_p7 = scmp.eq.s32.totalorder %s39_s23, 0 }
  0x12   : > { %p764_p8 = por %p57_p5, %p56_p3  ;;  %p140_p10 = scmp.eq.s32.totalorder %s423_s19, 1 }
  0x13   : > { %p768_p9 = por %p134_p6, %p50_p1  ;;  %p461_p13 = scmp.lt.s32.totalorder %s687_s17, 2 }
  0x14   : > { %s978_s24 = scalar_select %p764_p8, 1, 0 }
  0x15   : > { %s979_s25 = scalar_select %p768_p9, 1, 0 }
  0x16   : > { %s773_s26 = scalar_select %p41_p7, %s675_s14, %s43_s21  }
  0x17   : > { %p775_p11 = por %p140_p10, %p56_p3  ;;  %s782_s28 = sand.u32 1, %s675_s14  }
  0x18   : > { %980 = sst [smem:[#allocation14_spill]] %s773_s26  ;;  %s180_s29 = sand.u32 1, %s687_s17  }
  0x19   : > { %s981_s27 = scalar_select %p775_p11, 1, 0 }
  0x1a   : > { %p787_p0 = pnand %p461_p13, %p756_p4  ;;  %s428_s4 = sshll.u32 %s683_s16, 4 }
  0x1b   : > { %s183_s5 = scalar_lea.vmem [#allocation5], %s782_s28  ;;  %s983_s1 = sld [smem:[#allocation15_spill]] }
  0x1c   : > { %s982_s30 = scalar_select %p787_p0, 1, 0 }
  0x1d   : > { %s190_s6 = sshll.u32 %s183_s5, 4  ;;  %s803_s19 = scalar_lea.hbm %s967_s2, %s428_s4  ;;  %s798_s6 = int_to_ptr.vmem [resolvable:$true] %s190_s6 }
  0x1e   : > { %s805_s21 = scalar_lea.sflag [#allocation6], %s180_s29  ;;  %p811_p2 = pneg %p787_p0 }
  0x21   : > { %s796_s9 = scalar_lea.hbm %s983_s1, %s428_s4  ;;  %s516_s8 = scalar_lea.hbm %s983_s1, 32 }
  0x22   : > { %s511_s22 = scalar_lea.hbm %s796_s9, 16  ;;  %p517_p5 = scmp.lt.u32.totalorder %s796_s9, %s983_s1 }
  0x23   : > { %p512_p1 = scmp.ne.s32.totalorder %s796_s9, %s511_s22  ;;  %p518_p6 = scmp.lt.u32.totalorder %s516_s8, %s511_s22 }
  0x24   : > { %p520_p10 = scmp.lt.u32.totalorder %s511_s22, %s796_s9 }
  0x25   : > { %p514_p3 = pnand %p811_p2, %p512_p1  ;;  %p519_p7 = por %p518_p6, %p517_p5 }
  0x27   : > { %p515_p4 = pneg %p514_p3  ;;  %p521_p13 = por %p520_p10, %p519_p7 }
  0x29   : > { %p522_p12 = pnand %p521_p13, %p515_p4 }
  0x2b   : > { %525 = shalt.err (!%p522_p12)
}
  0x2c   : > { %s526_s29 = scalar_lea.vmem %s798_s6, 16  ;;  %s689_s11 = smov [#allocation5]  }
  0x2d   : > { %p527_p1 = scmp.ne.s32.totalorder %s798_s6, %s526_s29  ;;  %s531_s5 = sshll.u32 %s689_s11, 4  ;;  %s532_s5 = int_to_ptr.vmem [resolvable:$false] %s531_s5 }
  0x2e   : > { %s533_s7 = scalar_lea.vmem %s532_s5, 32  ;;  %p534_p9 = scmp.lt.s32.totalorder %s798_s6, %s532_s5 }
  0x2f   : > { %p529_p3 = pnand %p527_p1, %p811_p2  ;;  %p535_p8 = scmp.lt.s32.totalorder %s533_s7, %s526_s29 }
  0x31   : > { %p530_p11 = pneg %p529_p3  ;;  %p536_p5 = por %p535_p8, %p534_p9 }
  0x33   : > { %p537_p6 = pnand %p536_p5, %p530_p11 }
  0x35   : > { %540 = shalt.err (!%p537_p6)
}
  0x36   : > { %453 = dma.hbm_to_vmem [thread:$0]  (!%p787_p0), %s796_s9, 16, %s798_s6, %s805_s21  }
  0x37   : > { %p430_p12 = scmp.ge.s32.totalorder %s687_s17, 1  ;;  %p212_p4 = scmp.lt.s32.totalorder %s687_s17, 3 }
  0x38   : > { %s426_s8 = sshll.u32 %s782_s28, 1  ;;  %s427_s10 = sshll.u32 %s683_s16, 5 }
  0x39   : > { %p837_p7 = pnand %p430_p12, %p212_p4  ;;  %s846_s11 = scalar_lea.hbm %s965_s0, %s427_s10 }
  0x3a   : > { %s164_s5 = scalar_lea.vmem [#allocation2], %s426_s8  ;;  %s200_s6 = scalar_lea.vmem [#allocation7], %s782_s28 }
  0x3b   : > { %s985_s22 = scalar_select %p837_p7, 1, 0 }
  0x3c   : > { %s173_s7 = sshll.u32 %s164_s5, 4  ;;  %s851_s9 = sshll.u32 %s200_s6, 4  ;;  %s848_s7 = int_to_ptr.vmem [resolvable:$true] %s173_s7  ;;  %s208_s9 = int_to_ptr.vmem [resolvable:$true] %s851_s9 }
  0x3d   : > { %s161_s1 = scalar_lea.sflag [#allocation3], %s782_s28  ;;  %s541_s20 = scalar_lea.hbm %s846_s11, 32 }
  0x3e   : > { %p542_p8 = scmp.ne.s32.totalorder %s846_s11, %s541_s20  ;;  %s546_s29 = scalar_lea.hbm %s965_s0, 64 }
  0x3f   : > { %p547_p10 = scmp.lt.u32.totalorder %s846_s11, %s965_s0  ;;  %p548_p13 = scmp.lt.u32.totalorder %s546_s29, %s541_s20 }
  0x40   : > { %p544_p9 = pnand %p542_p8, %p811_p2  ;;  %p550_p3 = scmp.lt.u32.totalorder %s541_s20, %s846_s11 }
  0x41   : > { %p549_p1 = por %p548_p13, %p547_p10 }
  0x42   : > { %p545_p11 = pneg %p544_p9 }
  0x43   : > { %p551_p5 = por %p550_p3, %p549_p1 }
  0x45   : > { %p552_p6 = pnand %p551_p5, %p545_p11 }
  0x47   : > { %555 = shalt.err (!%p552_p6)
}
  0x48   : > { %s556_s28 = scalar_lea.vmem %s848_s7, 32  ;;  %s690_s8 = smov [#allocation2]  }
  0x49   : > { %p557_p12 = scmp.ne.s32.totalorder %s848_s7, %s556_s28  ;;  %s561_s5 = sshll.u32 %s690_s8, 4  ;;  %s562_s5 = int_to_ptr.vmem [resolvable:$false] %s561_s5 }
  0x4a   : > { %s563_s16 = scalar_lea.vmem %s562_s5, 64  ;;  %p564_p9 = scmp.lt.s32.totalorder %s848_s7, %s562_s5 }
  0x4b   : > { %p559_p4 = pnand %p557_p12, %p811_p2  ;;  %p565_p7 = scmp.lt.s32.totalorder %s563_s16, %s556_s28 }
  0x4d   : > { %p560_p8 = pneg %p559_p4  ;;  %p566_p10 = por %p565_p7, %p564_p9 }
  0x4f   : > { %p567_p13 = pnand %p566_p10, %p560_p8 }
  0x51   : > { %570 = shalt.err (!%p567_p13)
}
  0x52   : > { %450 = dma.hbm_to_vmem [thread:$0]  (!%p787_p0), %s846_s11, 32, %s848_s7, %s161_s1  }
  0x53   : > { %s571_s20 = scalar_lea.hbm %s803_s19, 16  ;;  %s576_s4 = scalar_lea.hbm %s967_s2, 32 }
  0x54   : > { %p572_p11 = scmp.ne.s32.totalorder %s803_s19, %s571_s20  ;;  %p577_p7 = scmp.lt.u32.totalorder %s803_s19, %s967_s2 }
  0x55   : > { %p578_p5 = scmp.lt.u32.totalorder %s576_s4, %s571_s20  ;;  %p580_p12 = scmp.lt.u32.totalorder %s571_s20, %s803_s19 }
  0x56   : > { %p574_p1 = pnand %p572_p11, %p811_p2 }
  0x57   : > { %p579_p6 = por %p578_p5, %p577_p7 }
  0x58   : > { %p575_p3 = pneg %p574_p1 }
  0x59   : > { %p581_p4 = por %p580_p12, %p579_p6 }
  0x5b   : > { %p582_p8 = pnand %p581_p4, %p575_p3 }
  0x5d   : > { %585 = shalt.err (!%p582_p8)
}
  0x5e   : > { %s586_s1 = scalar_lea.vmem %s208_s9, 16  ;;  %s691_s11 = smov [#allocation7]  }
  0x5f   : > { %p587_p9 = scmp.ne.s32.totalorder %s208_s9, %s586_s1  ;;  %s591_s7 = sshll.u32 %s691_s11, 4  ;;  %s592_s7 = int_to_ptr.vmem [resolvable:$false] %s591_s7 }
  0x60   : > { %s593_s28 = scalar_lea.vmem %s592_s7, 32  ;;  %p594_p11 = scmp.lt.s32.totalorder %s208_s9, %s592_s7 }
  0x61   : > { %p589_p10 = pnand %p587_p9, %p811_p2  ;;  %p595_p1 = scmp.lt.s32.totalorder %s593_s28, %s586_s1 }
  0x63   : > { %p590_p13 = pneg %p589_p10  ;;  %p596_p0 = por %p595_p1, %p594_p11 }
  0x65   : > { %p597_p5 = pnand %p596_p0, %p590_p13 }
  0x67   : > { %600 = shalt.err (!%p597_p5)
}
  0x68   : > { %p986_p7 = scmp.ne.s32.totalorder %s982_s30, 0  ;;  %p987_p3 = scmp.ne.s32.totalorder %s985_s22, 0 }
  0x69   : > { %s897_s23 = sand.u32 (!%p987_p3), 1, %s671_s13   ;;  %p988_p2 = scmp.ne.s32.totalorder (!%p987_p3), %s978_s24, 0 }
  0x6a   : > { %456 = dma.hbm_to_vmem [thread:$0]  (!%p986_p7), %s803_s19, 16, %s208_s9, %s805_s21  }
  0x6b   : > { %216 = sbr.rel (%p987_p3) target bundleno = 144 (0x90), region = 32  ;;  %s431_s8 = sshll.u32 (!%p987_p3), %s897_s23, 1 }
  0x6c   : > { %s219_s5 = scalar_lea.sflag (!%p987_p3), [#allocation3], %s897_s23  ;;  %s222_s16 = scalar_lea.vmem (!%p987_p3), [#allocation2], %s431_s8 }
  0x72   : > { %654 = dma.done.wait (%p988_p2), %s219_s5, 32  }
  0x73   : > { %656 = vsyncadd (%p988_p2), %s219_s5, 4294967264  ;;  %s227_s30 = sand.u32 1, %s744_s18   ;;  %s230_s21 = scalar_lea.vmem [#allocation5], %s897_s23 }
  0x74   : > { %s228_s19 = scalar_lea.sflag [#allocation6], %s227_s30 }
  0x75   : > { %658 = dma.done.wait (%p988_p2), %s228_s19, 32  }
  0x76   : > { %660 = vsyncadd (%p988_p2), %s228_s19, 4294967264  ;;  %s268_s22 = scalar_lea.vmem [#allocation8], %s431_s8  ;;  %s436_s20 = sshll.u32 %s679_s15, 5  ;;  %v269_v0 = vld [vmem:[%s222_s16] sm:$0x3] }
  0x77   : > { %s303_s9 = sshll.u32 %s268_s22, 4  ;;  %v433_v1 = vld [vmem:[%s230_s21] ss:$0 sm:$0xff]  ;;  %s238_s26 = scalar_lea.vmem [#allocation7], %s897_s23  ;;  %s913_s9 = int_to_ptr.vmem [resolvable:$true] %s303_s9 }
  0x78   : > { %v434_v2 = vld [vmem:[%s238_s26] ss:$0 sm:$0xff]  ;;  %v277_v3 = vmul.f32 %v433_v1, %v269_v0  ;;  %s918_s24 = scalar_lea.hbm %s968_s3, %s436_s20  ;;  %s288_s4 = scalar_lea.sflag [#allocation4], %s897_s23 }
  0x79   : > { %s601_s10 = scalar_lea.vmem %s913_s9, 32  ;;  %p989_p6 = scmp.ne.s32.totalorder %s979_s25, 0 }
  0x7a   : > { %v285_v4 = vadd.f32 %v434_v2, %v277_v3  ;;  %p602_p0 = scmp.ne.s32.totalorder %s913_s9, %s601_s10  ;;  %s692_s15 = smov [#allocation8]  }
  0x7b   : > { %s605_s29 = sshll.u32 %s692_s15, 4  ;;  %s606_s29 = int_to_ptr.vmem [resolvable:$false] %s605_s29 }
  0x7c   : > { %286 = vst [vmem:[%s268_s22] sm:$0x3] %v285_v4  ;;  %p603_p12 = pnand %p602_p0, %p989_p6  ;;  %s607_s1 = scalar_lea.vmem %s606_s29, 64 }
  0x7d   : > { %p608_p8 = scmp.lt.s32.totalorder %s913_s9, %s606_s29  ;;  %p609_p9 = scmp.lt.s32.totalorder %s607_s1, %s601_s10 }
  0x7e   : > { %p604_p4 = pneg %p603_p12 }
  0x7f   : > { %p610_p10 = por %p609_p9, %p608_p8 }
  0x81   : > { %p611_p13 = pnand %p610_p10, %p604_p4 }
  0x83   : > { %614 = shalt.err (!%p611_p13)
}
  0x84   : > { %s615_s11 = scalar_lea.hbm %s918_s24, 32  ;;  %s619_s23 = scalar_lea.hbm %s968_s3, 64 }
  0x85   : > { %p616_p11 = scmp.ne.s32.totalorder %s918_s24, %s615_s11  ;;  %p620_p7 = scmp.lt.u32.totalorder %s918_s24, %s968_s3 }
  0x86   : > { %p621_p3 = scmp.lt.u32.totalorder %s619_s23, %s615_s11  ;;  %p623_p0 = scmp.lt.u32.totalorder %s615_s11, %s918_s24 }
  0x87   : > { %p617_p1 = pnand %p616_p11, %p989_p6 }
  0x88   : > { %p622_p2 = por %p621_p3, %p620_p7 }
  0x89   : > { %p618_p5 = pneg %p617_p1 }
  0x8a   : > { %p624_p12 = por %p623_p0, %p622_p2 }
  0x8c   : > { %p625_p4 = pnand %p624_p12, %p618_p5 }
  0x8e   : > { %628 = shalt.err (!%p625_p4)
}
  0x8f   : > { %445 = dma.vmem_to_hbm [thread:$0]  (%p989_p6), %s913_s9, 32, %s918_s24, %s288_s4  }
  0x90 PF: > { %s315_s16 = sand.u32 1, %s667_s12   ;;  %p990_p8 = scmp.ne.s32.totalorder %s981_s27, 0 }
  0x91   : > { %p991_p9 = scmp.ge.s32.totalorder %s687_s17, 2  ;;  %s316_s30 = scalar_lea.sflag [#allocation4], %s315_s16 }
  0x93   : > { %p458_p10 = pnand %p991_p9, %p990_p8 }
  0x95   : > { %662 = dma.done.wait (!%p458_p10), %s316_s30, 32  }
  0x96   : > { %664 = vsyncadd (!%p458_p10), %s316_s30, 4294967264  ;;  %s22_s17 = sadd.s32 1, %s687_s17   ;;  %s992_s25 = sld [smem:[#allocation14_spill]] }
  0x97   : > { %p19_p13 = scmp.ge.s32.totalorder %s22_s17, 4   ;;  %s993_s15 = sld [smem:[#allocation12_spill]] }
  0x98   : > { %s994_s16 = sld [smem:[#allocation13_spill]]  ;;  %s995_s12 = smov %s671_s13 }
  0x99   : > { %s996_s13 = smov %s675_s14  ;;  %21 = sbr.rel (!%p19_p13) target bundleno = 10 (0xa), region = 101 }
  0x9c   : > { %s997_s14 = smov %s992_s25 }
  0xa0   :  { %321 = vsyncpa [#allocation3], 1 }
  0xa1   :  { %323 = vsyncpa [#allocation3 + $0x1], 1 }
  0xa2   :  { %324 = vsyncpa [#allocation6], 1 }
  0xa3   :  { %326 = vsyncpa [#allocation6 + $0x1], 1 }
  0xa4   :  { %327 = vsyncpa [#allocation4], 1 }
  0xa5   :  { %329 = vsyncpa [#allocation4 + $0x1], 1 }

</bundles_post_ra>
